<compile_context>
chip_gen: v7x
topology: tpu7x:2x2x1
jax: 0.10.0
libtpu: 0.0.40
codegen_flags: <defaults>
</compile_context>

<pallas_src>
import functools

import jax
import jax.numpy as jnp
from jax import lax
from jax.experimental import pallas as pl
from jax.experimental.pallas import tpu as pltpu


def _gat_kernel(x_ref, adj_ref, w_ref, ai_ref, ajt_ref, bias_ref, o_ref, *,
                num_heads, out_features, negative_slope, batch_block,
                num_agents):
    N = num_agents
    Fo = out_features

    x = x_ref[...]                                   # [Bt*N, F_in]
    # One wide MXU matmul for all heads: [Bt*N, H*F_out].
    h_all = jnp.dot(x, w_ref[...], preferred_element_type=jnp.float32)

    # Fused attention projections (2 MXU ops total, all heads & samples):
    #   ci_all[m, h] = <h_head_h[m], a_i[h]>   (column orientation)
    #   cj_all[h, m] = <h_head_h[m], a_j[h]>   (row orientation, no transpose)
    ci_all = jnp.dot(h_all, ai_ref[...], preferred_element_type=jnp.float32)
    cj_all = lax.dot_general(ajt_ref[...], h_all, (((1,), (1,)), ((), ())),
                             preferred_element_type=jnp.float32)

    bias = bias_ref[...]                             # [1, HF], hoisted load

    for b in range(batch_block):                     # static unroll, Bt capped
        adj_b = adj_ref[b]                           # [N, N]
        r0 = b * N
        head_outs = []
        for head in range(num_heads):                # static unroll
            c0 = head * Fo
            ci = ci_all[r0:r0 + N, head:head + 1]    # [N, 1]  (static slices)
            cj = cj_all[head:head + 1, r0:r0 + N]    # [1, N]
            coeff = ci + cj                          # [N, N] broadcast add

            # LeakyReLU
            e = jnp.where(coeff >= 0, coeff, negative_slope * coeff)

            # attention = softmax(e * adj, over j) * adj   (torch semantics)
            att = e * adj_b
            m = jnp.max(att, axis=-1, keepdims=True)
            p = jnp.exp(att - m)
            denom = jnp.sum(p, axis=-1, keepdims=True)
            att = (p * pl.reciprocal(denom, approx=True)) * adj_b
            # TODO(synk): F.dropout on the coefficients is omitted (eval-mode
            # forward); normalize=True / average=True branches not implemented
            # (module defaults are False).

            h_bh = h_all[r0:r0 + N, c0:c0 + Fo]                       # [N, Fo]
            head_outs.append(
                jnp.dot(att, h_bh, preferred_element_type=jnp.float32))

        # Lane-concat all heads and store once per sample (one lane-dense
        # [N, HF] store + one bias add, instead of H narrow masked stores).
        out_b = (head_outs[0] if num_heads == 1
                 else jnp.concatenate(head_outs, axis=-1))            # [N, HF]
        o_ref[r0:r0 + N, :] = out_b + bias


def _pick_batch_block(batch, num_agents):
    """Samples per grid step.

    Targets ~256 rows (Bt*N) for the fused x@W matmul (fills the MXU row dim on
    v6e/v7x; >=128 already fills v5e) while amortizing the per-grid-step
    pipeline overhead.  If the batch is split, Bt stays a multiple of 8 so all
    blocks remain sublane-tileable and is capped at 32 samples to bound the
    static unroll; small batches collapse to a single grid step (grid=(1,)).
    When the grid has >=2 steps they are marked "parallel" so both v7x
    TensorCores get work.
    """
    if batch % 8 != 0 or batch * num_agents <= 256:
        return batch
    bt = max(8, min(batch, ((256 // max(num_agents, 1)) // 8) * 8, 32))
    while batch % bt != 0:
        bt -= 8
    return max(bt, 8)


def graph_attention_gat(x, adj, W, a_i, a_j, bias, *, num_heads, out_features,
                        negative_slope=0.2, self_loop_type=2):
    """x: [B, N, F_in], adj: [B, N, N] -> [B, N, H*F_out]."""
    B, N, F_in = x.shape
    H = num_heads
    HF = H * out_features

    x = x.astype(jnp.float32)
    adj = adj.astype(jnp.float32)
    W = W.astype(jnp.float32)

    # Self-loop handling hoisted out of the kernel (grid-invariant; fuses with
    # the XLA producer of adj).
    if self_loop_type == 0:
        eye = jnp.eye(N, dtype=jnp.float32)
        adj = adj * (1.0 - eye)[None]
    elif self_loop_type == 1:
        eye = jnp.eye(N, dtype=jnp.float32)
        adj = eye[None] + adj * (1.0 - eye)[None]

    # Block-diagonal fused projection matrices:
    #   a_i_blk[h*Fo + f, g] = a_i[h, f] * delta(h, g)   -> [HF, H]
    #   a_j_blk_t = transpose of the a_j analogue         -> [H, HF]
    eye_h = jnp.eye(H, dtype=jnp.float32)
    a_i_blk = (a_i.astype(jnp.float32)[:, :, 0][:, :, None]
               * eye_h[:, None, :]).reshape(HF, H)
    a_j_blk_t = ((a_j.astype(jnp.float32)[:, :, 0][:, :, None]
                  * eye_h[:, None, :]).reshape(HF, H)).T

    bias_r = bias.reshape(1, HF).astype(jnp.float32)

    bt = _pick_batch_block(B, N)
    rows = bt * N
    grid = (B // bt,)

    x2 = x.reshape(B * N, F_in)

    kernel = functools.partial(
        _gat_kernel, num_heads=H, out_features=out_features,
        negative_slope=negative_slope, batch_block=bt, num_agents=N)

    out = pl.pallas_call(
        kernel,
        out_shape=jax.ShapeDtypeStruct((B * N, HF), jnp.float32),
        grid_spec=pltpu.PrefetchScalarGridSpec(
            num_scalar_prefetch=0,
            grid=grid,
            in_specs=[
                pl.BlockSpec((rows, F_in), lambda g: (g, 0)),     # x (flattened)
                pl.BlockSpec((bt, N, N), lambda g: (g, 0, 0)),    # adj
                pl.BlockSpec((F_in, HF), lambda g: (0, 0)),       # W
                pl.BlockSpec((HF, H), lambda g: (0, 0)),          # a_i (block-diag)
                pl.BlockSpec((H, HF), lambda g: (0, 0)),          # a_j^T (block-diag)
                pl.BlockSpec((1, HF), lambda g: (0, 0)),          # bias
            ],
            out_specs=pl.BlockSpec((rows, HF), lambda g: (g, 0)),
        ),
        compiler_params=pltpu.CompilerParams(
            dimension_semantics=("parallel",)),
    )(x2, adj, W, a_i_blk, a_j_blk_t, bias_r)

    return out.reshape(B, N, HF)


def _reference(x, adj, W, a_i, a_j, bias, *, num_heads, out_features,
               negative_slope=0.2, self_loop_type=2):
    """Pure-JAX transcription of the torch forward (eval mode)."""
    B, N, F_in = x.shape
    h = (x @ W).reshape(B, N, num_heads, out_features)
    if self_loop_type == 0:
        adj = adj * (1.0 - jnp.eye(N))[None]
    elif self_loop_type == 1:
        adj = jnp.eye(N)[None] + adj * (1.0 - jnp.eye(N))[None]
    es = []
    for head in range(num_heads):
        ci = h[:, :, head, :] @ a_i[head]                 # [B,N,1]
        cj = h[:, :, head, :] @ a_j[head]                 # [B,N,1]
        es.append((ci + jnp.swapaxes(cj, 1, 2))[..., None])
    e = jnp.concatenate(es, axis=-1)
    e = jnp.where(e >= 0, e, negative_slope * e)
    adj4 = adj[..., None]
    att = e * adj4
    att = jax.nn.softmax(att, axis=2)
    att = att * adj4
    outs = [att[:, :, :, head] @ h[:, :, head, :] for head in range(num_heads)]
    return jnp.concatenate(outs, axis=-1) + bias


if __name__ == "__main__":
    B, N = 2, 8                 # batch, num_agents
    F_IN, F_OUT, H = 32, 16, 2  # in_features, out_features, num_heads
    NEG_SLOPE = 0.2
    SELF_LOOP = 2

    key = jax.random.PRNGKey(0)
    kx, ka, kw, ki, kj = jax.random.split(key, 5)

    x = jax.random.normal(kx, (B, N, F_IN), dtype=jnp.float32)
    adj = jax.nn.sigmoid(jax.random.normal(ka, (B, N, N), dtype=jnp.float32))

    # Deterministic xavier_normal-style init (gain = sqrt(2) as in torch 'relu').
    gain = jnp.sqrt(2.0)
    std_w = gain * jnp.sqrt(2.0 / (F_IN + H * F_OUT))
    W = std_w * jax.random.normal(kw, (F_IN, H * F_OUT), dtype=jnp.float32)
    std_a = gain * jnp.sqrt(2.0 / (F_OUT + H))
    a_i = std_a * jax.random.normal(ki, (H, F_OUT, 1), dtype=jnp.float32)
    a_j = std_a * jax.random.normal(kj, (H, F_OUT, 1), dtype=jnp.float32)
    bias = jnp.zeros((H * F_OUT,), dtype=jnp.float32)  # torch uses float64 zeros; kept f32

    out = graph_attention_gat(
        x, adj, W, a_i, a_j, bias,
        num_heads=H, out_features=F_OUT,
        negative_slope=NEG_SLOPE, self_loop_type=SELF_LOOP)
    out = jax.block_until_ready(out)

    ref = _reference(
        x, adj, W, a_i, a_j, bias,
        num_heads=H, out_features=F_OUT,
        negative_slope=NEG_SLOPE, self_loop_type=SELF_LOOP)

    assert out.shape == (B, N, H * F_OUT)
    # Tolerance slightly loosened vs exact-divide version: softmax denominator
    # uses the EUP approximate reciprocal (pl.reciprocal(approx=True)).
    assert jnp.allclose(out, ref, atol=5e-3, rtol=5e-3)
    print("KERNEL_OK")
</pallas_src>

<mosaic_0001>
module attributes {stable_mosaic.version = 11 : i64} {
  func.func @_gat_kernel(%arg0: i32, %arg1: memref<16x32xf32, #tpu.memory_space<vmem>>, %arg2: memref<2x8x8xf32, #tpu.memory_space<vmem>>, %arg3: memref<32x32xf32, #tpu.memory_space<vmem>>, %arg4: memref<32x2xf32, #tpu.memory_space<vmem>>, %arg5: memref<2x32xf32, #tpu.memory_space<vmem>>, %arg6: memref<1x32xf32, #tpu.memory_space<vmem>>, %arg7: memref<16x32xf32, #tpu.memory_space<vmem>>) attributes {dimension_semantics = [#tpu.dimension_semantics<parallel>], iteration_bounds = array<i64: 1>, scalar_prefetch = 0 : i64, scratch_operands = 0 : i64, tpu.core_type = #tpu.core_type<tc>, window_params = [{transform_indices = @transform_0, window_bounds = array<i64: 16, 32>}, {transform_indices = @transform_1, window_bounds = array<i64: 2, 8, 8>}, {pipeline_mode = #tpu.pipeline_mode<synchronous>, transform_indices = @transform_2, window_bounds = array<i64: 32, 32>}, {pipeline_mode = #tpu.pipeline_mode<synchronous>, transform_indices = @transform_3, window_bounds = array<i64: 32, 2>}, {pipeline_mode = #tpu.pipeline_mode<synchronous>, transform_indices = @transform_4, window_bounds = array<i64: 2, 32>}, {pipeline_mode = #tpu.pipeline_mode<synchronous>, transform_indices = @transform_5, window_bounds = array<i64: 1, 32>}, {transform_indices = @transform_6, window_bounds = array<i64: 16, 32>}]} {
    %c0 = arith.constant 0 : index
    %c0_0 = arith.constant 0 : index
    %0 = vector.load %arg1[%c0, %c0_0] : memref<16x32xf32, #tpu.memory_space<vmem>>, vector<16x32xf32>
    %c0_1 = arith.constant 0 : index
    %c0_2 = arith.constant 0 : index
    %1 = vector.load %arg3[%c0_1, %c0_2] : memref<32x32xf32, #tpu.memory_space<vmem>>, vector<32x32xf32>
    %cst = arith.constant dense<0.000000e+00> : vector<16x32xf32>
    %2 = tpu.matmul %0, %1, %cst {dimension_numbers = #tpu.dot_dimension_numbers<[1], [0], [0], [1], [0, 0, 1, 1], [], []>} : vector<16x32xf32>, vector<32x32xf32>, vector<16x32xf32> -> vector<16x32xf32>
    %c0_3 = arith.constant 0 : index
    %c0_4 = arith.constant 0 : index
    %3 = vector.load %arg4[%c0_3, %c0_4] : memref<32x2xf32, #tpu.memory_space<vmem>>, vector<32x2xf32>
    %cst_5 = arith.constant dense<0.000000e+00> : vector<16x2xf32>
    %4 = tpu.matmul %2, %3, %cst_5 {dimension_numbers = #tpu.dot_dimension_numbers<[1], [0], [0], [1], [0, 0, 1, 1], [], []>} : vector<16x32xf32>, vector<32x2xf32>, vector<16x2xf32> -> vector<16x2xf32>
    %c0_6 = arith.constant 0 : index
    %c0_7 = arith.constant 0 : index
    %5 = vector.load %arg5[%c0_6, %c0_7] : memref<2x32xf32, #tpu.memory_space<vmem>>, vector<2x32xf32>
    %cst_8 = arith.constant dense<0.000000e+00> : vector<2x16xf32>
    %6 = tpu.matmul %5, %2, %cst_8 {dimension_numbers = #tpu.dot_dimension_numbers<[1], [1], [0], [0], [0, 0, 1, 0], [], []>} : vector<2x32xf32>, vector<16x32xf32>, vector<2x16xf32> -> vector<2x16xf32>
    %c0_9 = arith.constant 0 : index
    %c0_10 = arith.constant 0 : index
    %7 = vector.load %arg6[%c0_9, %c0_10] : memref<1x32xf32, #tpu.memory_space<vmem>>, vector<1x32xf32>
    %c0_11 = arith.constant 0 : index
    %c0_12 = arith.constant 0 : index
    %c0_13 = arith.constant 0 : index
    %8 = vector.load %arg2[%c0_11, %c0_12, %c0_13] : memref<2x8x8xf32, #tpu.memory_space<vmem>>, vector<1x8x8xf32>
    %9 = vector.shape_cast %8 : vector<1x8x8xf32> to vector<8x8xf32>
    %10 = vector.extract_strided_slice %4 {offsets = [0, 0], sizes = [8, 1], strides = [1, 1]} : vector<16x2xf32> to vector<8x1xf32>
    %11 = vector.extract_strided_slice %6 {offsets = [0, 0], sizes = [1, 8], strides = [1, 1]} : vector<2x16xf32> to vector<1x8xf32>
    %12 = vector.broadcast %10 : vector<8x1xf32> to vector<8x8xf32>
    %13 = vector.broadcast %11 : vector<1x8xf32> to vector<8x8xf32>
    %14 = arith.addf %12, %13 : vector<8x8xf32>
    %cst_14 = arith.constant 0.000000e+00 : f32
    %15 = vector.broadcast %cst_14 : f32 to vector<8x8xf32>
    %16 = arith.cmpf oge, %14, %15 : vector<8x8xf32>
    %cst_15 = arith.constant 2.000000e-01 : f32
    %17 = vector.broadcast %cst_15 : f32 to vector<8x8xf32>
    %18 = arith.mulf %17, %14 : vector<8x8xf32>
    %19 = arith.select %16, %14, %18 : vector<8x8xi1>, vector<8x8xf32>
    %20 = arith.mulf %19, %9 : vector<8x8xf32>
    %cst_16 = arith.constant dense<0xFF800000> : vector<8xf32>
    %21 = vector.multi_reduction <maximumf>, %20, %cst_16 [1] : vector<8x8xf32> to vector<8xf32>
    %22 = vector.shape_cast %21 : vector<8xf32> to vector<8x1xf32>
    %23 = vector.broadcast %22 : vector<8x1xf32> to vector<8x8xf32>
    %24 = arith.subf %20, %23 : vector<8x8xf32>
    %25 = math.exp %24 : vector<8x8xf32>
    %cst_17 = arith.constant dense<0.000000e+00> : vector<8xf32>
    %26 = vector.multi_reduction <add>, %25, %cst_17 [1] : vector<8x8xf32> to vector<8xf32>
    %27 = vector.shape_cast %26 : vector<8xf32> to vector<8x1xf32>
    %28 = tpu.reciprocal %27 {approx = true} : vector<8x1xf32> -> vector<8x1xf32>
    %29 = vector.broadcast %28 : vector<8x1xf32> to vector<8x8xf32>
    %30 = arith.mulf %25, %29 : vector<8x8xf32>
    %31 = arith.mulf %30, %9 : vector<8x8xf32>
    %32 = vector.extract_strided_slice %2 {offsets = [0, 0], sizes = [8, 16], strides = [1, 1]} : vector<16x32xf32> to vector<8x16xf32>
    %cst_18 = arith.constant dense<0.000000e+00> : vector<8x16xf32>
    %33 = tpu.matmul %31, %32, %cst_18 {dimension_numbers = #tpu.dot_dimension_numbers<[1], [0], [0], [1], [0, 0, 1, 1], [], []>} : vector<8x8xf32>, vector<8x16xf32>, vector<8x16xf32> -> vector<8x16xf32>
    %34 = vector.extract_strided_slice %4 {offsets = [0, 1], sizes = [8, 1], strides = [1, 1]} : vector<16x2xf32> to vector<8x1xf32>
    %35 = vector.extract_strided_slice %6 {offsets = [1, 0], sizes = [1, 8], strides = [1, 1]} : vector<2x16xf32> to vector<1x8xf32>
    %36 = vector.broadcast %34 : vector<8x1xf32> to vector<8x8xf32>
    %37 = vector.broadcast %35 : vector<1x8xf32> to vector<8x8xf32>
    %38 = arith.addf %36, %37 : vector<8x8xf32>
    %cst_19 = arith.constant 0.000000e+00 : f32
    %39 = vector.broadcast %cst_19 : f32 to vector<8x8xf32>
    %40 = arith.cmpf oge, %38, %39 : vector<8x8xf32>
    %cst_20 = arith.constant 2.000000e-01 : f32
    %41 = vector.broadcast %cst_20 : f32 to vector<8x8xf32>
    %42 = arith.mulf %41, %38 : vector<8x8xf32>
    %43 = arith.select %40, %38, %42 : vector<8x8xi1>, vector<8x8xf32>
    %44 = arith.mulf %43, %9 : vector<8x8xf32>
    %cst_21 = arith.constant dense<0xFF800000> : vector<8xf32>
    %45 = vector.multi_reduction <maximumf>, %44, %cst_21 [1] : vector<8x8xf32> to vector<8xf32>
    %46 = vector.shape_cast %45 : vector<8xf32> to vector<8x1xf32>
    %47 = vector.broadcast %46 : vector<8x1xf32> to vector<8x8xf32>
    %48 = arith.subf %44, %47 : vector<8x8xf32>
    %49 = math.exp %48 : vector<8x8xf32>
    %cst_22 = arith.constant dense<0.000000e+00> : vector<8xf32>
    %50 = vector.multi_reduction <add>, %49, %cst_22 [1] : vector<8x8xf32> to vector<8xf32>
    %51 = vector.shape_cast %50 : vector<8xf32> to vector<8x1xf32>
    %52 = tpu.reciprocal %51 {approx = true} : vector<8x1xf32> -> vector<8x1xf32>
    %53 = vector.broadcast %52 : vector<8x1xf32> to vector<8x8xf32>
    %54 = arith.mulf %49, %53 : vector<8x8xf32>
    %55 = arith.mulf %54, %9 : vector<8x8xf32>
    %56 = vector.extract_strided_slice %2 {offsets = [0, 16], sizes = [8, 16], strides = [1, 1]} : vector<16x32xf32> to vector<8x16xf32>
    %cst_23 = arith.constant dense<0.000000e+00> : vector<8x16xf32>
    %57 = tpu.matmul %55, %56, %cst_23 {dimension_numbers = #tpu.dot_dimension_numbers<[1], [0], [0], [1], [0, 0, 1, 1], [], []>} : vector<8x8xf32>, vector<8x16xf32>, vector<8x16xf32> -> vector<8x16xf32>
    %58 = tpu.concatenate %33, %57 in 1 : vector<8x16xf32>, vector<8x16xf32> -> vector<8x32xf32>
    %59 = vector.broadcast %7 : vector<1x32xf32> to vector<8x32xf32>
    %60 = arith.addf %58, %59 : vector<8x32xf32>
    %c0_24 = arith.constant 0 : index
    %c0_25 = arith.constant 0 : index
    %61 = vector.load %arg7[%c0_24, %c0_25] : memref<16x32xf32, #tpu.memory_space<vmem>>, vector<8x32xf32>
    tpu.vector_store %arg7[%c0_24, %c0_25], %60 {strides = array<i32>} : memref<16x32xf32, #tpu.memory_space<vmem>>, vector<8x32xf32>,
    %c1 = arith.constant 1 : index
    %c0_26 = arith.constant 0 : index
    %c0_27 = arith.constant 0 : index
    %62 = vector.load %arg2[%c1, %c0_26, %c0_27] : memref<2x8x8xf32, #tpu.memory_space<vmem>>, vector<1x8x8xf32>
    %63 = vector.shape_cast %62 : vector<1x8x8xf32> to vector<8x8xf32>
    %64 = vector.extract_strided_slice %4 {offsets = [8, 0], sizes = [8, 1], strides = [1, 1]} : vector<16x2xf32> to vector<8x1xf32>
    %65 = vector.extract_strided_slice %6 {offsets = [0, 8], sizes = [1, 8], strides = [1, 1]} : vector<2x16xf32> to vector<1x8xf32>
    %66 = vector.broadcast %64 : vector<8x1xf32> to vector<8x8xf32>
    %67 = vector.broadcast %65 : vector<1x8xf32> to vector<8x8xf32>
    %68 = arith.addf %66, %67 : vector<8x8xf32>
    %cst_28 = arith.constant 0.000000e+00 : f32
    %69 = vector.broadcast %cst_28 : f32 to vector<8x8xf32>
    %70 = arith.cmpf oge, %68, %69 : vector<8x8xf32>
    %cst_29 = arith.constant 2.000000e-01 : f32
    %71 = vector.broadcast %cst_29 : f32 to vector<8x8xf32>
    %72 = arith.mulf %71, %68 : vector<8x8xf32>
    %73 = arith.select %70, %68, %72 : vector<8x8xi1>, vector<8x8xf32>
    %74 = arith.mulf %73, %63 : vector<8x8xf32>
    %cst_30 = arith.constant dense<0xFF800000> : vector<8xf32>
    %75 = vector.multi_reduction <maximumf>, %74, %cst_30 [1] : vector<8x8xf32> to vector<8xf32>
    %76 = vector.shape_cast %75 : vector<8xf32> to vector<8x1xf32>
    %77 = vector.broadcast %76 : vector<8x1xf32> to vector<8x8xf32>
    %78 = arith.subf %74, %77 : vector<8x8xf32>
    %79 = math.exp %78 : vector<8x8xf32>
    %cst_31 = arith.constant dense<0.000000e+00> : vector<8xf32>
    %80 = vector.multi_reduction <add>, %79, %cst_31 [1] : vector<8x8xf32> to vector<8xf32>
    %81 = vector.shape_cast %80 : vector<8xf32> to vector<8x1xf32>
    %82 = tpu.reciprocal %81 {approx = true} : vector<8x1xf32> -> vector<8x1xf32>
    %83 = vector.broadcast %82 : vector<8x1xf32> to vector<8x8xf32>
    %84 = arith.mulf %79, %83 : vector<8x8xf32>
    %85 = arith.mulf %84, %63 : vector<8x8xf32>
    %86 = vector.extract_strided_slice %2 {offsets = [8, 0], sizes = [8, 16], strides = [1, 1]} : vector<16x32xf32> to vector<8x16xf32>
    %cst_32 = arith.constant dense<0.000000e+00> : vector<8x16xf32>
    %87 = tpu.matmul %85, %86, %cst_32 {dimension_numbers = #tpu.dot_dimension_numbers<[1], [0], [0], [1], [0, 0, 1, 1], [], []>} : vector<8x8xf32>, vector<8x16xf32>, vector<8x16xf32> -> vector<8x16xf32>
    %88 = vector.extract_strided_slice %4 {offsets = [8, 1], sizes = [8, 1], strides = [1, 1]} : vector<16x2xf32> to vector<8x1xf32>
    %89 = vector.extract_strided_slice %6 {offsets = [1, 8], sizes = [1, 8], strides = [1, 1]} : vector<2x16xf32> to vector<1x8xf32>
    %90 = vector.broadcast %88 : vector<8x1xf32> to vector<8x8xf32>
    %91 = vector.broadcast %89 : vector<1x8xf32> to vector<8x8xf32>
    %92 = arith.addf %90, %91 : vector<8x8xf32>
    %cst_33 = arith.constant 0.000000e+00 : f32
    %93 = vector.broadcast %cst_33 : f32 to vector<8x8xf32>
    %94 = arith.cmpf oge, %92, %93 : vector<8x8xf32>
    %cst_34 = arith.constant 2.000000e-01 : f32
    %95 = vector.broadcast %cst_34 : f32 to vector<8x8xf32>
    %96 = arith.mulf %95, %92 : vector<8x8xf32>
    %97 = arith.select %94, %92, %96 : vector<8x8xi1>, vector<8x8xf32>
    %98 = arith.mulf %97, %63 : vector<8x8xf32>
    %cst_35 = arith.constant dense<0xFF800000> : vector<8xf32>
    %99 = vector.multi_reduction <maximumf>, %98, %cst_35 [1] : vector<8x8xf32> to vector<8xf32>
    %100 = vector.shape_cast %99 : vector<8xf32> to vector<8x1xf32>
    %101 = vector.broadcast %100 : vector<8x1xf32> to vector<8x8xf32>
    %102 = arith.subf %98, %101 : vector<8x8xf32>
    %103 = math.exp %102 : vector<8x8xf32>
    %cst_36 = arith.constant dense<0.000000e+00> : vector<8xf32>
    %104 = vector.multi_reduction <add>, %103, %cst_36 [1] : vector<8x8xf32> to vector<8xf32>
    %105 = vector.shape_cast %104 : vector<8xf32> to vector<8x1xf32>
    %106 = tpu.reciprocal %105 {approx = true} : vector<8x1xf32> -> vector<8x1xf32>
    %107 = vector.broadcast %106 : vector<8x1xf32> to vector<8x8xf32>
    %108 = arith.mulf %103, %107 : vector<8x8xf32>
    %109 = arith.mulf %108, %63 : vector<8x8xf32>
    %110 = vector.extract_strided_slice %2 {offsets = [8, 16], sizes = [8, 16], strides = [1, 1]} : vector<16x32xf32> to vector<8x16xf32>
    %cst_37 = arith.constant dense<0.000000e+00> : vector<8x16xf32>
    %111 = tpu.matmul %109, %110, %cst_37 {dimension_numbers = #tpu.dot_dimension_numbers<[1], [0], [0], [1], [0, 0, 1, 1], [], []>} : vector<8x8xf32>, vector<8x16xf32>, vector<8x16xf32> -> vector<8x16xf32>
    %112 = tpu.concatenate %87, %111 in 1 : vector<8x16xf32>, vector<8x16xf32> -> vector<8x32xf32>
    %113 = vector.broadcast %7 : vector<1x32xf32> to vector<8x32xf32>
    %114 = arith.addf %112, %113 : vector<8x32xf32>
    %c8 = arith.constant 8 : index
    %c0_38 = arith.constant 0 : index
    %115 = vector.load %arg7[%c8, %c0_38] : memref<16x32xf32, #tpu.memory_space<vmem>>, vector<8x32xf32>
    tpu.vector_store %arg7[%c8, %c0_38], %114 {strides = array<i32>} : memref<16x32xf32, #tpu.memory_space<vmem>>, vector<8x32xf32>,
    return
  }
  func.func @transform_0(%arg0: i32) -> (i32, i32) {
    %c0_i32 = arith.constant 0 : i32
    %c0_i32_0 = arith.constant 0 : i32
    return %arg0, %c0_i32 : i32, i32
  }
  func.func @transform_1(%arg0: i32) -> (i32, i32, i32) {
    %c0_i32 = arith.constant 0 : i32
    %c0_i32_0 = arith.constant 0 : i32
    %c0_i32_1 = arith.constant 0 : i32
    return %arg0, %c0_i32, %c0_i32_0 : i32, i32, i32
  }
  func.func @transform_2(%arg0: i32) -> (i32, i32) {
    %c0_i32 = arith.constant 0 : i32
    %c0_i32_0 = arith.constant 0 : i32
    %c0_i32_1 = arith.constant 0 : i32
    return %c0_i32, %c0_i32_0 : i32, i32
  }
  func.func @transform_3(%arg0: i32) -> (i32, i32) {
    %c0_i32 = arith.constant 0 : i32
    %c0_i32_0 = arith.constant 0 : i32
    %c0_i32_1 = arith.constant 0 : i32
    return %c0_i32, %c0_i32_0 : i32, i32
  }
  func.func @transform_4(%arg0: i32) -> (i32, i32) {
    %c0_i32 = arith.constant 0 : i32
    %c0_i32_0 = arith.constant 0 : i32
    %c0_i32_1 = arith.constant 0 : i32
    return %c0_i32, %c0_i32_0 : i32, i32
  }
  func.func @transform_5(%arg0: i32) -> (i32, i32) {
    %c0_i32 = arith.constant 0 : i32
    %c0_i32_0 = arith.constant 0 : i32
    %c0_i32_1 = arith.constant 0 : i32
    return %c0_i32, %c0_i32_0 : i32, i32
  }
  func.func @transform_6(%arg0: i32) -> (i32, i32) {
    %c0_i32 = arith.constant 0 : i32
    %c0_i32_0 = arith.constant 0 : i32
    return %arg0, %c0_i32 : i32, i32
  }
}

</mosaic_0001>

<bundles_post_ra>
// kernel: tpu_custom_call.1
= control target key start
LH: loop header
LB: loop body
LE: loop exit
PB: predicated region body
PF: predicated region fallthrough
CT: control target
= control target key end

     0   :  { %11 = vsyncpa [#allocation3], 0  ;;  %s1150_s0 = inlined_call_operand.hbm [shape: f32[16,32], index: 0, kind: input, shape index: {}]   ;;  %s1151_s1 = inlined_call_operand.hbm [shape: f32[2,8,8], index: 1, kind: input, shape index: {}]   ;;  %s1152_s2 = inlined_call_operand.vmem [shape: f32[32,32], index: 2, kind: input, shape index: {}]   ;;  %s1153_s3 = inlined_call_operand.vmem [shape: f32[32,2], index: 3, kind: input, shape index: {}]   ;;  %s1154_s4 = inlined_call_operand.vmem [shape: f32[2,32], index: 4, kind: input, shape index: {}]   ;;  %s1155_s5 = inlined_call_operand.vmem [shape: f32[1,32], index: 5, kind: input, shape index: {}]   ;;  %s1156_s6 = inlined_call_operand.hbm [shape: f32[16,32], index: 6, kind: output, shape index: {}]  }
   0x1   :  { %12 = vsyncpa [#allocation6], 0 }
   0x2   :  { %13 = vsyncpa [#allocation4], 0  ;;  %s961_s21 = smov [#allocation2]   ;;  %s889_s25 = scalar_lea.hbm %s1150_s0, 256 }
   0x3   :  { %s19_s22 = sshll.u32 %s961_s21, 4  ;;  %p890_p0 = scmp.ne.s32.totalorder %s1150_s0, %s889_s25  ;;  %s20_s22 = int_to_ptr.vmem [resolvable:$true] %s19_s22 }
   0x4   :  { %p893_p1 = scmp.lt.u32.totalorder %s889_s25, %s1150_s0 }
   0x6   :  { %p895_p2 = pnand %p893_p1, %p890_p0 }
   0x8   :  { %898 = shalt.err (!%p895_p2)
}
   0x9   :  { %s899_s30 = scalar_lea.vmem %s20_s22, 256  ;;  %p904_p4 = scmp.lt.s32.totalorder %s20_s22, %s20_s22 }
   0xa   :  { %p900_p3 = scmp.ne.s32.totalorder %s20_s22, %s899_s30  ;;  %p905_p5 = scmp.lt.s32.totalorder %s899_s30, %s899_s30 }
   0xc   :  { %p906_p6 = por %p905_p5, %p904_p4 }
   0xe   :  { %p907_p7 = pnand %p906_p6, %p900_p3 }
  0x10   :  { %910 = shalt.err (!%p907_p7)
}
  0x11   :  { %s962_s7 = smov 128   ;;  %s963_s8 = smov 8  }
  0x12   :  { %25 = dma.hbm_to_vmem [thread:$0]  %s1150_s0, 256, %s20_s22, [#allocation3], %s962_s7, %s962_s7, %s963_s8  }
  0x13   :  { %s964_s11 = smov [#allocation5]   ;;  %s911_s15 = scalar_lea.hbm %s1151_s1, 256 }
  0x14   :  { %s31_s12 = sshll.u32 %s964_s11, 4  ;;  %p912_p8 = scmp.ne.s32.totalorder %s1151_s1, %s911_s15  ;;  %s32_s12 = int_to_ptr.vmem [resolvable:$true] %s31_s12 }
  0x15   :  { %p915_p9 = scmp.lt.u32.totalorder %s911_s15, %s1151_s1 }
  0x17   :  { %p917_p10 = pnand %p915_p9, %p912_p8 }
  0x19   :  { %920 = shalt.err (!%p917_p10)
}
  0x1a   :  { %s921_s20 = scalar_lea.vmem %s32_s12, 256  ;;  %p926_p12 = scmp.lt.s32.totalorder %s32_s12, %s32_s12 }
  0x1b   :  { %p922_p11 = scmp.ne.s32.totalorder %s32_s12, %s921_s20  ;;  %p927_p13 = scmp.lt.s32.totalorder %s921_s20, %s921_s20 }
  0x1d   :  { %p928_p0 = por %p927_p13, %p926_p12 }
  0x1f   :  { %p929_p1 = pnand %p928_p0, %p922_p11 }
  0x21   :  { %932 = shalt.err (!%p929_p1)
}
  0x22   :  { %37 = dma.hbm_to_vmem [thread:$0]  %s1151_s1, 256, %s32_s12, [#allocation6], %s962_s7, %s962_s7, %s963_s8  }
  0x23   :  { %955 = dma.done.wait [#allocation3], 256  }
  0x24   :  { %956 = vsyncadd [#allocation3], 4294967040 }
  0x25   :  { %957 = dma.done.wait [#allocation6], 256  }
  0x26   :  { %958 = vsyncadd [#allocation6], 4294967040  ;;  %vm58_vm0 = vcmask 261120   ;;  %v54_v0 = vld [vmem:[%s1152_s2] sm:$0xff]  ;;  %v55_v1 = vld [vmem:[%s1152_s2 + $0x8] sm:$0xff]  ;;  %v965_v14 = vmov 0.0   ;;  %v306_v27 = vlaneseq }
  0x27   :  { %v56_v2 = vld [vmem:[%s1152_s2 + $0x10] sm:$0xff]  ;;  %v836_v3 = vpack.c.bf16 %v55_v1, %v54_v0  ;;  %v57_v4 = vld [vmem:[%s1152_s2 + $0x18] sm:$0xff]  ;;  %v52_v5 = vld [vmem:[#allocation2] sm:$0xff]  ;;  %v966_v15 = vmov 0.0|0.0   ;;  %vm967_vm1 = vmmov 0   ;;  %v968_v16 = vmov 1  }
  0x28   :  { %v840_v6 = vpack.c.bf16 %v57_v4, %v56_v2  ;;  %795 = vmatprep.mubr.msk.f32.mxu0 %vm58_vm0, %v52_v5  ;;  %v140_v7 = vld [vmem:[%s1153_s3] sm:$0xff]  ;;  %v141_v8 = vld [vmem:[%s1153_s3 + $0x8] sm:$0xff]  ;;  %v142_v9 = vld [vmem:[%s1153_s3 + $0x10] sm:$0xff]  ;;  %869 = vset.pattern.permute.xlu0 %v968_v16  ;;  %v969_v17 = vmov 0   ;;  %v307_v28 = vshrl.u32 %v306_v27, 7  ;;  %vm532_vm5 = vcmask 130112  }
  0x29   :  { %837 = vmatprep.subr.bf16.mxu0 %v836_v3  ;;  %v844_v10 = vpack.c.bf16 %v141_v8, %v140_v7  ;;  %v143_v11 = vld [vmem:[%s1153_s3 + $0x18] sm:$0xff]  ;;  %v53_v13 = vld [vmem:[#allocation2 + $0x8] sm:$0xff]  ;;  %870 = vset.pattern.permute.xlu1 %v969_v17  ;;  %vm854_vm2 = vmpackc.low %vm58_vm0, %vm58_vm0  ;;  %vm315_vm7 = vcmask 64512   ;;  %s971_s15 = smov 112   ;;  %s972_s16 = smov 16   ;;  %vm506_vm9 = vcmask 130048  }
  0x2a   :  { %839 = vmatpush3.bf16.msra.mxu0 %v836_v3  ;;  %v848_v12 = vpack.c.bf16 %v143_v11, %v142_v9  ;;  %v225_v21 = vld [vmem:[%s1154_s4] sm:$0x3]  ;;  %v517_v24 = vld [vmem:[#allocation5 + $0x8] sm:$0xff]  ;;  %v308_v29 = vsub.s32 0, %v307_v28  ;;  %v407_v30 = vsub.s32 1, %v307_v28  ;;  %v1097_v49 = vld [vmem:[#allocation5] sm:$0xff] }
  0x2b   :  { %841 = vmatprep.subr.bf16.mxu0 %v840_v6  ;;  %845 = vmatprep.subr.bf16.mxu1 %v844_v10  ;;  %s970_s4 = smov 120   ;;  %s973_s19 = smov [#allocation7]  }
  0x2c   :  { %847 = vmatpush3.bf16.msra.mxu1 %v844_v10  ;;  %s739_s20 = sshll.u32 %s973_s19, 4  ;;  %s740_s20 = int_to_ptr.vmem [resolvable:$true] %s739_s20 }
  0x2d   :  { %849 = vmatprep.subr.bf16.mxu1 %v848_v12  ;;  %s933_s0 = scalar_lea.vmem %s740_s20, 256  ;;  %p938_p3 = scmp.lt.s32.totalorder %s740_s20, %s740_s20 }
  0x2e   :  { %843 = vmatpush3.bf16.msra.mxu0 %v840_v6  ;;  %p934_p2 = scmp.ne.s32.totalorder %s740_s20, %s933_s0  ;;  %p939_p4 = scmp.lt.s32.totalorder %s933_s0, %s933_s0 }
  0x2f   :  { %852 = vmatprep.subr.bf16.mxu0 %v966_v15 }
  0x30   :  { %851 = vmatpush3.bf16.msra.mxu1 %v848_v12  ;;  %p940_p5 = por %p939_p4, %p938_p3 }
  0x31   :  { %796 = vmatmul.mubr.msk.f32.vlgmr.msra.gmra.mrb[0].mxu0 %vm58_vm0, %v53_v13  ;;  %816 = vmatprep.subr.mxu1 %v965_v14 }
  0x32   :  { %813 = vmatprep.mubr.msk.f32.mxu0 %vm967_vm1, %v965_v14  ;;  %p941_p6 = pnand %p940_p5, %p934_p2 }
 0x104   :  { %v1068_v18 = vpop.f32.mrb[0].mxu0 }
 0x105   :  { %v1070_v19 = vpop.f32.mrb[1].mxu0 }
 0x106   :  { %v853_v20 = vpack.c.bf16 %v1068_v18, %v1070_v19  ;;  %806 = vmatprep.mubr.msk.f32.mxu1 %vm58_vm0, %v1070_v19 }
 0x107   :  { %807 = vmatmul.mubr.msk.f32.vlgmr.msra.gmra.mrb[0].mxu1 %vm58_vm0, %v1068_v18 }
 0x108   :  { %817 = vmatpush3.msra.mxu1 %v1070_v19  ;;  %855 = vmatpush3.bf16.xpose.msk.msra.mxu0 %vm854_vm2, %v853_v20 }
 0x109   :  { %826 = vmatprep.subr.mxu0 %v965_v14  ;;  %818 = vmatprep.mubr.msk.f32.mxu1 %vm967_vm1, %v965_v14 }
 0x10a   :  { %821 = vmatprep.subr.mxu1 %v965_v14 }
 0x10f   :  { %814 = vmatmul.mubr.msk.f32.vlgmr.msra.gmra.mrb[2].mxu0 %vm58_vm0, %v225_v21 }
 0x110   :  { %827 = vmatpush3.msra.mxu0 %v1068_v18  ;;  %828 = vmatprep.mubr.msk.f32.mxu0 %vm967_vm1, %v965_v14 }
 0x1da   :  { %v808_v22 = vpop.f32.mrb[0].mxu1 }
 0x1db   :  { %520 = vperm.xlu1 %870, %v808_v22   ;;  %625 = vperm.xlu0 %869, %v808_v22   ;;  %v216_v23 = vpop.f32.mrb[1].mxu1 }
 0x1df   :  { %528 = vrot.lane.b32.xlu0 %v517_v24, %s963_s8 }
 0x1e0   :  { %871 = vset.pattern.permute.xlu0 %v969_v17 }
 0x1e2   :  { %v295_v25 = vpop.f32.mrb[2].mxu0 }
 0x1e3   :  { %303 = vperm.xlu0 %871, %v216_v23   ;;  %v815_v26 = vpop.f32.mrb[3].mxu0  ;;  %v309_v31 = vrot.slane %v295_v25, %v308_v29  ;;  %v408_v32 = vrot.slane %v295_v25, %v407_v30 }
 0x1e7   :  { %872 = vset.pattern.permute.xlu0 %v968_v16 }
 0x1e8   :  { %402 = vperm.xlu0 %872, %v216_v23  }
 0x25a   :  { %v521_v33 = vpop.permute.xlu1 %520  ;;  %v626_v34 = vpop.permute.xlu0 %625 }
 0x25b   :  { %v523_v35 = vadd.f32 %v521_v33, %v309_v31  ;;  %v628_v36 = vadd.f32 %v626_v34, %v408_v32 }
 0x25d   :  { %vm524_vm3 = vcmp.ge.f32.partialorder %v523_v35, 0.0  ;;  %v525_v37 = vmul.f32 0.2, %v523_v35  ;;  %vm629_vm4 = vcmp.ge.f32.partialorder %v628_v36, 0.0  ;;  %v630_v38 = vmul.f32 0.2, %v628_v36 }
 0x25e   :  { %v1093_v39 = vpop.permute.xlu0 %528 }
 0x25f   :  { %v631_v40 = vsel %vm629_vm4, %v628_v36, %v630_v38  ;;  %v526_v41 = vsel %vm524_vm3, %v523_v35, %v525_v37 }
 0x260   :  { %v632_v42 = vmul.f32 %v631_v40, %v1093_v39  ;;  %v531_v43 = vmul.f32 %v1093_v39, %v526_v41 }
 0x262   :  { %v304_v44 = vpop.permute.xlu0 %303  ;;  %v633_v45 = vsel %vm532_vm5, %v632_v42, -inf  ;;  %v533_v46 = vsel %vm532_vm5, %v531_v43, -inf }
 0x263   :  { %v310_v47 = vadd.f32 %v309_v31, %v304_v44  ;;  %634 = vmax.xlane.f32.xlu1 %v633_v45  ;;  %534 = vmax.xlane.f32.xlu0 %v533_v46  ;;  %v761_v44 = vld [vmem:[%s1155_s5] ss:$0 sm:$0xff] }
 0x265   :  { %vm311_vm6 = vcmp.ge.f32.partialorder %v310_v47, 0.0  ;;  %v312_v48 = vmul.f32 0.2, %v310_v47 }
 0x267   :  { %v313_v50 = vsel %vm311_vm6, %v310_v47, %v312_v48  ;;  %v403_v53 = vpop.permute.xlu0 %402 }
 0x268   :  { %v314_v51 = vmul.f32 %v313_v50, %v1097_v49  ;;  %v409_v0 = vadd.f32 %v408_v32, %v403_v53 }
 0x26a   :  { %v316_v52 = vsel %vm315_vm7, %v314_v51, -inf  ;;  %v411_v2 = vmul.f32 0.2, %v409_v0  ;;  %vm410_vm8 = vcmp.ge.f32.partialorder %v409_v0, 0.0 }
 0x26b   :  { %317 = vmax.xlane.f32.xlu0 %v316_v52 }
 0x26c   :  { %v412_v3 = vsel %vm410_vm8, %v409_v0, %v411_v2 }
 0x26d   :  { %v413_v4 = vmul.f32 %v412_v3, %v1097_v49 }
 0x26f   :  { %v414_v5 = vsel %vm315_vm7, %v413_v4, -inf }
 0x2f0   :  { %v635_v54 = vpop.xlane.xlu1 %634  ;;  %v535_v55 = vpop.xlane.xlu0 %534 }
 0x2f1   :  { %v636_v56 = vsub.f32 %v632_v42, %v635_v54  ;;  %v536_v57 = vsub.f32 %v531_v43, %v535_v55 }
 0x2f3   :  { %v637_v58 = vmul.f32 1.442695, %v636_v56  ;;  %v537_v59 = vmul.f32 1.442695, %v536_v57 }
 0x2f5   :  { %873 = vpow2.f32 %v637_v58 }
 0x2f6   :  { %875 = vpow2.f32 %v537_v59 }
 0x2f8   :  { %v318_v62 = vpop.xlane.xlu0 %317 }
 0x2f9   :  { %v319_v63 = vsub.f32 %v314_v51, %v318_v62 }
 0x2fb   :  { %v320_v1 = vmul.f32 1.442695, %v319_v63 }
 0x2fd   :  { %877 = vpow2.f32 %v320_v1 }
 0x2ff   :  { %v874_v60 = vpop.eup %873 }
 0x300   :  { %v1101_v61 = vpop.eup %875  ;;  %640 = vrot.lane.b32.xlu1 %v874_v60, %s970_s4 }
 0x301   :  { %540 = vrot.lane.b32.xlu0 %v1101_v61, %s970_s4 }
 0x307   :  { %v878_v6 = vpop.eup %877 }
 0x308   :  { %v322_v7 = vsel %vm315_vm7, %v878_v6, 0.0 }
 0x324   :  { %415 = vmax.xlane.f32.xlu1 %v414_v5 }
 0x328   :  { %323 = vadd.xlane.f32.xlu1 %v322_v7 }
 0x372   :  { %v641_v8 = vpop.permute.xlu1 %640 }
 0x373   :  { %v643_v9 = vsel %vm315_vm7, %v641_v8, 0.0 }
 0x374   :  { %644 = vadd.xlane.f32.xlu0 %v643_v9 }
 0x38a   :  { %652 = vrot.lane.b32.xlu0 %v1068_v18, %s971_s15  ;;  %v541_v18 = vpop.permute.xlu0 %540 }
 0x38b   :  { %v543_v22 = vsel %vm315_vm7, %v541_v18, 0.0 }
 0x3b1   :  { %v416_v10 = vpop.xlane.xlu1 %415 }
 0x3b2   :  { %v417_v11 = vsub.f32 %v413_v4, %v416_v10 }
 0x3b4   :  { %v418_v12 = vmul.f32 1.442695, %v417_v11 }
 0x3b5   :  { %v324_v13 = vpop.xlane.xlu1 %323 }
 0x3b6   :  { %879 = vpow2.f32 %v418_v12 }
 0x3b7   :  { %881 = vrcp.f32 %v324_v13 }
 0x3c0   :  { %v880_v15 = vpop.eup %879 }
 0x3c1   :  { %v882_v16 = vpop.eup %881  ;;  %v420_v17 = vsel %vm315_vm7, %v880_v15, 0.0 }
 0x3c2   :  { %v326_v20 = vmul.f32 %v882_v16, %v878_v6  ;;  %421 = vadd.xlane.f32.xlu1 %v420_v17 }
 0x3c4   :  { %v327_v21 = vmul.f32 %v326_v20, %v1097_v49 }
 0x3c6   :  { %819 = vmatmul.mubr.msk.f32.vlgmr.msra.gmra.mrb[2].mxu1 %vm315_vm7, %v327_v21 }
 0x3c7   :  { %823 = vmatprep.mubr.msk.f32.mxu1 %vm967_vm1, %v965_v14 }
 0x3d3   :  { %426 = vrot.lane.b32.xlu1 %v1070_v19, %s971_s15 }
 0x3f7   :  { %544 = vadd.xlane.f32.xlu1 %v543_v22 }
 0x401   :  { %v645_v23 = vpop.xlane.xlu0 %644 }
 0x402   :  { %883 = vrcp.f32 %v645_v23 }
 0x405   :  { %v653_v31 = vpop.permute.xlu0 %652 }
 0x40c   :  { %v884_v24 = vpop.eup %883 }
 0x40d   :  { %v647_v25 = vmul.f32 %v884_v24, %v874_v60 }
 0x40f   :  { %v648_v26 = vmul.f32 %v647_v25, %v1093_v39 }
 0x411   :  { %650 = vrot.lane.b32.xlu1 %v648_v26, %s970_s4 }
 0x44f   :  { %v422_v27 = vpop.xlane.xlu1 %421 }
 0x450   :  { %885 = vrcp.f32 %v422_v27 }
 0x453   :  { %v427_v28 = vpop.permute.xlu1 %426 }
 0x454   :  { %822 = vmatpush3.msra.mxu1 %v427_v28 }
 0x455   :  { %831 = vmatprep.subr.mxu1 %v965_v14 }
 0x45a   :  { %v886_v29 = vpop.eup %885 }
 0x45b   :  { %v424_v19 = vmul.f32 %v886_v29, %v880_v15 }
 0x45d   :  { %v425_v30 = vmul.f32 %v424_v19, %v1097_v49 }
 0x45f   :  { %824 = vmatmul.mubr.msk.f32.vlgmr.msra.gmra.mrb[4].mxu1 %vm315_vm7, %v425_v30 }
 0x460   :  { %832 = vmatpush3.msra.mxu1 %v653_v31  ;;  %833 = vmatprep.mubr.msk.f32.mxu1 %vm967_vm1, %v965_v14 }
 0x484   :  { %v545_v32 = vpop.xlane.xlu1 %544 }
 0x485   :  { %887 = vrcp.f32 %v545_v32 }
 0x488   :  { %v651_v33 = vpop.permute.xlu1 %650 }
 0x489   :  { %834 = vmatmul.mubr.msk.f32.vlgmr.msra.gmra.mrb[6].mxu1 %vm315_vm7, %v651_v33 }
 0x48f   :  { %v888_v34 = vpop.eup %887 }
 0x490   :  { %v547_v35 = vmul.f32 %v888_v34, %v1101_v61 }
 0x492   :  { %v548_v36 = vmul.f32 %v547_v35, %v1093_v39 }
 0x494   :  { %550 = vrot.lane.b32.xlu1 %v548_v36, %s970_s4 }
 0x499   :  { %v397_v37 = vpop.f32.mrb[2].mxu1 }
 0x49a   :  { %v820_v38 = vpop.f32.mrb[3].mxu1 }
 0x506   :  { %v551_v40 = vpop.permute.xlu1 %550 }
 0x507   :  { %829 = vmatmul.mubr.msk.f32.vlgmr.msra.gmra.mrb[4].mxu0 %vm315_vm7, %v551_v40 }
 0x532   :  { %v498_v41 = vpop.f32.mrb[4].mxu1 }
 0x533   :  { %v825_v42 = vpop.f32.mrb[5].mxu1  ;;  %503 = vrot.lane.b32.xlu1 %v498_v41, %s972_s16 }
 0x55c   :  { %v723_v14 = vpop.f32.mrb[6].mxu1 }
 0x55d   :  { %728 = vrot.lane.b32.xlu0 %v723_v14, %s972_s16  ;;  %v835_v43 = vpop.f32.mrb[7].mxu1 }
 0x5a5   :  { %v504_v39 = vpop.permute.xlu1 %503 }
 0x5a6   :  { %v507_v45 = vsel %vm506_vm9, %v397_v37, %v504_v39 }
 0x5a7   :  { %v514_v46 = vadd.f32 %v761_v44, %v507_v45 }
 0x5a9   :  { %515 = vst.msk [vmem:[#allocation7] sm:$0xff] %vm58_vm0, %v514_v46 }
 0x5cf   :  { %v729_v47 = vpop.permute.xlu0 %728 }
 0x5da   :  { %v620_v48 = vpop.f32.mrb[4].mxu0 }
 0x5db   :  { %v731_v49 = vsel %vm506_vm9, %v620_v48, %v729_v47  ;;  %v830_v50 = vpop.f32.mrb[5].mxu0 }
 0x5dc   :  { %v732_v51 = vadd.f32 %v761_v44, %v731_v49 }
 0x5de   :  { %733 = vst.msk [vmem:[#allocation7 + $0x8] sm:$0xff] %vm58_vm0, %v732_v51 }
 0x5df   :  { %944 = shalt.err (!%p941_p6)
}
 0x5e0   :  { %s945_s22 = scalar_lea.hbm %s1156_s6, 256 }
 0x5e1   :  { %p946_p7 = scmp.ne.s32.totalorder %s1156_s6, %s945_s22  ;;  %p949_p8 = scmp.lt.u32.totalorder %s945_s22, %s1156_s6 }
 0x5e3   :  { %p951_p9 = pnand %p949_p8, %p946_p7 }
 0x5e5   :  { %954 = shalt.err (!%p951_p9)
}
 0x5e6   :  { %745 = dma.vmem_to_hbm [thread:$0]  %s740_s20, 256, %s1156_s6, [#allocation4], %s962_s7, %s962_s7, %s963_s8  }
 0x5e7   :  { %959 = dma.done.wait [#allocation4], 256  }
 0x5e8   :  { %960 = vsyncadd [#allocation4], 4294967040 }
 0x5e9   :  { %749 = vsyncpa [#allocation3], 1 }
 0x5ea   :  { %750 = vsyncpa [#allocation6], 1 }
 0x5eb   :  { %751 = vsyncpa [#allocation4], 1 }

</bundles_post_ra>
